<compile_context>
chip_gen: v7x
topology: tpu7x:2x2x1
jax: 0.10.0
libtpu: 0.0.40
codegen_flags: <defaults>
</compile_context>

<pallas_src>
import functools

import jax
import jax.numpy as jnp
from jax.experimental import pallas as pl
from jax.experimental.pallas import tpu as pltpu


# ----------------------------- config (small, consistent with the module) ---
CONFIG = dict(
    length_seq=16,              # input_sequence_length (L)
    evo_input_embed_dim=4,      # C
    evo_input_length=8,         # D
    num_hidden_patch_embed=2,   # number of hidden Linear layers (N)
    hidden_dim_patch_embed=32,  # H
    dropout=0.0,                # TODO(synk): nonzero (training-mode) dropout not applied in-kernel
)
BATCH = 2
BATCH_TILE = 1024               # max rows of x processed per grid step (multiple of 8)


def _round_up(n, m):
    return ((n + m - 1) // m) * m


# ----------------------------- Pallas kernel --------------------------------
def _patch_embed_kernel(x_ref, w0_ref, b_ref, wh_ref, wout_ref, bfin_ref,
                        emb_ref, tok_ref, *, num_hidden):
    """Fused MLP: Linear -> [ReLU -> Linear]*N -> ReLU -> Linear (+ pos_embed),
    emitting both the f32 embedding and its int32 truncation (torch .long()).

    Per grid step (weights resident in VMEM, x/outputs batch-tiled):
      x:    (TB, L)
      w0:   (L, H)
      b:    (N+1, 1, H)     -- b[0] is the first-layer bias, b[1..N] the hidden biases
      wh:   (N, H, H)
      wout: (H, C*D)
      bfin: (1, C*D)        -- bout + flattened pos_embed (pre-folded)
      emb:  (TB, C*D) f32
      tok:  (TB, C*D) int32
    """
    h = jnp.dot(x_ref[...], w0_ref[...],
                preferred_element_type=jnp.float32) + b_ref[0]
    for i in range(num_hidden):                      # static unroll (tiny N)
        h = jnp.maximum(h, 0.0)                      # ReLU
        h = jnp.dot(h, wh_ref[i],
                    preferred_element_type=jnp.float32) + b_ref[i + 1]
    h = jnp.maximum(h, 0.0)                          # final ReLU
    y = jnp.dot(h, wout_ref[...],
                preferred_element_type=jnp.float32) + bfin_ref[...]
    emb_ref[...] = y
    tok_ref[...] = y.astype(jnp.int32)               # fused x.long() (truncate toward zero)


# ----------------------------- wrapper ---------------------------------------
def prepare_params(params, cfg):
    """One-time folding of parameters into the kernel's input layout."""
    C = cfg['evo_input_embed_dim']
    D = cfg['evo_input_length']
    out_dim = C * D
    return dict(
        w0=params['w0'],
        # first-layer bias + hidden biases in a single VMEM input
        b_all=jnp.concatenate([params['b0'][None], params['bh']], axis=0),
        wh=params['wh'],
        wout=params['wout'],
        # final bias and positional embedding added to the same tensor -> fold once, host-side
        bfin=params['bout'] + params['pos'].reshape(1, out_dim),
    )


def patch_embed_pallas(x, prep, cfg, *, batch_tile=BATCH_TILE):
    B, L = x.shape
    C = cfg['evo_input_embed_dim']
    D = cfg['evo_input_length']
    OD = C * D
    N = cfg['num_hidden_patch_embed']
    H = cfg['hidden_dim_patch_embed']

    # Batch tile: multiple of 8 sublanes, capped at batch_tile; pad B up to a tile multiple.
    TB = min(batch_tile, _round_up(B, 8))
    B_pad = _round_up(B, TB)
    if B_pad != B:
        x = jnp.pad(x, ((0, B_pad - B), (0, 0)))
    grid = (B_pad // TB,)

    kernel = functools.partial(_patch_embed_kernel, num_hidden=N)
    emb_flat, tok_flat = pl.pallas_call(
        kernel,
        grid=grid,
        in_specs=[
            pl.BlockSpec((TB, L), lambda i: (i, 0)),            # x: batch-tiled
            pl.BlockSpec((L, H), lambda i: (0, 0)),             # weights: constant block
            pl.BlockSpec((N + 1, 1, H), lambda i: (0, 0, 0)),   #   -> fetched once, VMEM-
            pl.BlockSpec((N, H, H), lambda i: (0, 0, 0)),       #      resident across steps
            pl.BlockSpec((H, OD), lambda i: (0, 0)),
            pl.BlockSpec((1, OD), lambda i: (0, 0)),
        ],
        out_specs=(
            pl.BlockSpec((TB, OD), lambda i: (i, 0)),
            pl.BlockSpec((TB, OD), lambda i: (i, 0)),
        ),
        out_shape=(
            jax.ShapeDtypeStruct((B_pad, OD), jnp.float32),
            jax.ShapeDtypeStruct((B_pad, OD), jnp.int32),
        ),
        compiler_params=pltpu.CompilerParams(
            dimension_semantics=("parallel",),   # batch grid shards across cores
        ),
    )(x, prep['w0'], prep['b_all'], prep['wh'], prep['wout'], prep['bfin'])

    # rearrange 'b (c d) -> b c d' (pos_embed add already done in-kernel on the flat layout)
    emb = emb_flat[:B].reshape(B, C, D)
    tok = tok_flat[:B].reshape(B, C, D)
    return emb, tok


def evomamba_forward(x, prep, cfg):
    """Reproduces EvoMamba.forward up to the externally-defined submodules."""
    emb, tokens = patch_embed_pallas(x, prep, cfg)    # PatchEmbed.forward + x.long()
    # TODO(synk): self.evo_model / self.mamba / self.regressor are external pretrained
    # modules (Evo LM, videomamba_tiny, TokenRegressor) with no definitions provided.
    return emb, tokens


# ----------------------------- param init (deterministic, synthetic) --------
def init_params(key, cfg):
    L = cfg['length_seq']
    H = cfg['hidden_dim_patch_embed']
    C = cfg['evo_input_embed_dim']
    D = cfg['evo_input_length']
    N = cfg['num_hidden_patch_embed']
    out_dim = C * D
    ks = jax.random.split(key, 7)
    s = 0.1
    return dict(
        w0=jax.random.normal(ks[0], (L, H), jnp.float32) * s,
        b0=jax.random.normal(ks[1], (1, H), jnp.float32) * s,
        wh=jax.random.normal(ks[2], (N, H, H), jnp.float32) * s,
        bh=jax.random.normal(ks[3], (N, 1, H), jnp.float32) * s,
        wout=jax.random.normal(ks[4], (H, out_dim), jnp.float32) * s,
        bout=jax.random.normal(ks[5], (1, out_dim), jnp.float32) * s,
        # nn.Parameter(torch.zeros(1, C, D)) — randomized here so the add is exercised
        pos=jax.random.normal(ks[6], (1, C, D), jnp.float32) * s,
    )


# ----------------------------- pure-JAX reference ----------------------------
def patch_embed_ref(x, p, cfg):
    C, D = cfg['evo_input_embed_dim'], cfg['evo_input_length']
    h = x @ p['w0'] + p['b0']
    for i in range(cfg['num_hidden_patch_embed']):
        h = jnp.maximum(h, 0.0) @ p['wh'][i] + p['bh'][i]
    y = jnp.maximum(h, 0.0) @ p['wout'] + p['bout']
    return y.reshape(x.shape[0], C, D) + p['pos']


if __name__ == "__main__":
    key = jax.random.PRNGKey(0)
    k_x, k_p, k_x2 = jax.random.split(key, 3)
    C, D = CONFIG['evo_input_embed_dim'], CONFIG['evo_input_length']

    params = init_params(k_p, CONFIG)
    prep = prepare_params(params, CONFIG)

    # --- small demo shape (B=2), single grid step --------------------------
    x = jax.random.normal(k_x, (BATCH, CONFIG['length_seq']), jnp.float32)
    emb, tokens = evomamba_forward(x, prep, CONFIG)
    emb = jax.block_until_ready(emb)
    tokens = jax.block_until_ready(tokens)

    ref = patch_embed_ref(x, params, CONFIG)
    assert emb.shape == (BATCH, C, D)
    assert tokens.dtype == jnp.int32
    assert jnp.allclose(emb, ref, atol=1e-5, rtol=1e-5), "embedding mismatch vs reference"
    assert jnp.array_equal(tokens, emb.astype(jnp.int32)), "fused .long() cast mismatch"

    # --- larger batch: exercises padding / resident weights / parallel grid --
    B2 = 600   # non-multiple of 8 -> exercises batch padding path
    x2 = jax.random.normal(k_x2, (B2, CONFIG['length_seq']), jnp.float32)
    emb2, tok2 = evomamba_forward(x2, prep, CONFIG)
    emb2 = jax.block_until_ready(emb2)
    tok2 = jax.block_until_ready(tok2)

    ref2 = patch_embed_ref(x2, params, CONFIG)
    assert emb2.shape == (B2, C, D)
    assert jnp.allclose(emb2, ref2, atol=1e-5, rtol=1e-5), "batched embedding mismatch"
    assert jnp.array_equal(tok2, emb2.astype(jnp.int32)), "batched fused cast mismatch"

    print("KERNEL_OK")
</pallas_src>

<mosaic_0001>
module attributes {stable_mosaic.version = 11 : i64} {
  func.func @_patch_embed_kernel(%arg0: i32, %arg1: memref<8x16xf32, #tpu.memory_space<vmem>>, %arg2: memref<16x32xf32, #tpu.memory_space<vmem>>, %arg3: memref<3x1x32xf32, #tpu.memory_space<vmem>>, %arg4: memref<2x32x32xf32, #tpu.memory_space<vmem>>, %arg5: memref<32x32xf32, #tpu.memory_space<vmem>>, %arg6: memref<1x32xf32, #tpu.memory_space<vmem>>, %arg7: memref<8x32xf32, #tpu.memory_space<vmem>>, %arg8: memref<8x32xi32, #tpu.memory_space<vmem>>) attributes {dimension_semantics = [#tpu.dimension_semantics<parallel>], iteration_bounds = array<i64: 1>, scalar_prefetch = 0 : i64, scratch_operands = 0 : i64, tpu.core_type = #tpu.core_type<tc>, window_params = [{transform_indices = @transform_0, window_bounds = array<i64: 8, 16>}, {pipeline_mode = #tpu.pipeline_mode<synchronous>, transform_indices = @transform_1, window_bounds = array<i64: 16, 32>}, {pipeline_mode = #tpu.pipeline_mode<synchronous>, transform_indices = @transform_2, window_bounds = array<i64: 3, 1, 32>}, {pipeline_mode = #tpu.pipeline_mode<synchronous>, transform_indices = @transform_3, window_bounds = array<i64: 2, 32, 32>}, {pipeline_mode = #tpu.pipeline_mode<synchronous>, transform_indices = @transform_4, window_bounds = array<i64: 32, 32>}, {pipeline_mode = #tpu.pipeline_mode<synchronous>, transform_indices = @transform_5, window_bounds = array<i64: 1, 32>}, {transform_indices = @transform_6, window_bounds = array<i64: 8, 32>}, {transform_indices = @transform_7, window_bounds = array<i64: 8, 32>}]} {
    %c0 = arith.constant 0 : index
    %c0_0 = arith.constant 0 : index
    %0 = vector.load %arg1[%c0, %c0_0] : memref<8x16xf32, #tpu.memory_space<vmem>>, vector<8x16xf32>
    %c0_1 = arith.constant 0 : index
    %c0_2 = arith.constant 0 : index
    %1 = vector.load %arg2[%c0_1, %c0_2] : memref<16x32xf32, #tpu.memory_space<vmem>>, vector<16x32xf32>
    %cst = arith.constant dense<0.000000e+00> : vector<8x32xf32>
    %2 = tpu.matmul %0, %1, %cst {dimension_numbers = #tpu.dot_dimension_numbers<[1], [0], [0], [1], [0, 0, 1, 1], [], []>} : vector<8x16xf32>, vector<16x32xf32>, vector<8x32xf32> -> vector<8x32xf32>
    %c0_3 = arith.constant 0 : index
    %c0_4 = arith.constant 0 : index
    %c0_5 = arith.constant 0 : index
    %3 = vector.load %arg3[%c0_3, %c0_4, %c0_5] : memref<3x1x32xf32, #tpu.memory_space<vmem>>, vector<1x1x32xf32>
    %4 = vector.shape_cast %3 : vector<1x1x32xf32> to vector<1x32xf32>
    %5 = vector.broadcast %4 : vector<1x32xf32> to vector<8x32xf32>
    %6 = arith.addf %2, %5 : vector<8x32xf32>
    %cst_6 = arith.constant 0.000000e+00 : f32
    %7 = vector.broadcast %cst_6 : f32 to vector<8x32xf32>
    %8 = arith.maximumf %6, %7 : vector<8x32xf32>
    %c0_7 = arith.constant 0 : index
    %c0_8 = arith.constant 0 : index
    %c0_9 = arith.constant 0 : index
    %9 = vector.load %arg4[%c0_7, %c0_8, %c0_9] : memref<2x32x32xf32, #tpu.memory_space<vmem>>, vector<1x32x32xf32>
    %10 = vector.shape_cast %9 : vector<1x32x32xf32> to vector<32x32xf32>
    %cst_10 = arith.constant dense<0.000000e+00> : vector<8x32xf32>
    %11 = tpu.matmul %8, %10, %cst_10 {dimension_numbers = #tpu.dot_dimension_numbers<[1], [0], [0], [1], [0, 0, 1, 1], [], []>} : vector<8x32xf32>, vector<32x32xf32>, vector<8x32xf32> -> vector<8x32xf32>
    %c1 = arith.constant 1 : index
    %c0_11 = arith.constant 0 : index
    %c0_12 = arith.constant 0 : index
    %12 = vector.load %arg3[%c1, %c0_11, %c0_12] : memref<3x1x32xf32, #tpu.memory_space<vmem>>, vector<1x1x32xf32>
    %13 = vector.shape_cast %12 : vector<1x1x32xf32> to vector<1x32xf32>
    %14 = vector.broadcast %13 : vector<1x32xf32> to vector<8x32xf32>
    %15 = arith.addf %11, %14 : vector<8x32xf32>
    %cst_13 = arith.constant 0.000000e+00 : f32
    %16 = vector.broadcast %cst_13 : f32 to vector<8x32xf32>
    %17 = arith.maximumf %15, %16 : vector<8x32xf32>
    %c1_14 = arith.constant 1 : index
    %c0_15 = arith.constant 0 : index
    %c0_16 = arith.constant 0 : index
    %18 = vector.load %arg4[%c1_14, %c0_15, %c0_16] : memref<2x32x32xf32, #tpu.memory_space<vmem>>, vector<1x32x32xf32>
    %19 = vector.shape_cast %18 : vector<1x32x32xf32> to vector<32x32xf32>
    %cst_17 = arith.constant dense<0.000000e+00> : vector<8x32xf32>
    %20 = tpu.matmul %17, %19, %cst_17 {dimension_numbers = #tpu.dot_dimension_numbers<[1], [0], [0], [1], [0, 0, 1, 1], [], []>} : vector<8x32xf32>, vector<32x32xf32>, vector<8x32xf32> -> vector<8x32xf32>
    %c2 = arith.constant 2 : index
    %c0_18 = arith.constant 0 : index
    %c0_19 = arith.constant 0 : index
    %21 = vector.load %arg3[%c2, %c0_18, %c0_19] : memref<3x1x32xf32, #tpu.memory_space<vmem>>, vector<1x1x32xf32>
    %22 = vector.shape_cast %21 : vector<1x1x32xf32> to vector<1x32xf32>
    %23 = vector.broadcast %22 : vector<1x32xf32> to vector<8x32xf32>
    %24 = arith.addf %20, %23 : vector<8x32xf32>
    %cst_20 = arith.constant 0.000000e+00 : f32
    %25 = vector.broadcast %cst_20 : f32 to vector<8x32xf32>
    %26 = arith.maximumf %24, %25 : vector<8x32xf32>
    %c0_21 = arith.constant 0 : index
    %c0_22 = arith.constant 0 : index
    %27 = vector.load %arg5[%c0_21, %c0_22] : memref<32x32xf32, #tpu.memory_space<vmem>>, vector<32x32xf32>
    %cst_23 = arith.constant dense<0.000000e+00> : vector<8x32xf32>
    %28 = tpu.matmul %26, %27, %cst_23 {dimension_numbers = #tpu.dot_dimension_numbers<[1], [0], [0], [1], [0, 0, 1, 1], [], []>} : vector<8x32xf32>, vector<32x32xf32>, vector<8x32xf32> -> vector<8x32xf32>
    %c0_24 = arith.constant 0 : index
    %c0_25 = arith.constant 0 : index
    %29 = vector.load %arg6[%c0_24, %c0_25] : memref<1x32xf32, #tpu.memory_space<vmem>>, vector<1x32xf32>
    %30 = vector.broadcast %29 : vector<1x32xf32> to vector<8x32xf32>
    %31 = arith.addf %28, %30 : vector<8x32xf32>
    %c0_26 = arith.constant 0 : index
    %c0_27 = arith.constant 0 : index
    %32 = vector.load %arg7[%c0_26, %c0_27] : memref<8x32xf32, #tpu.memory_space<vmem>>, vector<8x32xf32>
    tpu.vector_store %arg7[%c0_26, %c0_27], %31 {strides = array<i32>} : memref<8x32xf32, #tpu.memory_space<vmem>>, vector<8x32xf32>,
    %33 = arith.fptosi %31 : vector<8x32xf32> to vector<8x32xi32>
    %c0_28 = arith.constant 0 : index
    %c0_29 = arith.constant 0 : index
    %34 = vector.load %arg8[%c0_28, %c0_29] : memref<8x32xi32, #tpu.memory_space<vmem>>, vector<8x32xi32>
    tpu.vector_store %arg8[%c0_28, %c0_29], %33 {strides = array<i32>} : memref<8x32xi32, #tpu.memory_space<vmem>>, vector<8x32xi32>,
    return
  }
  func.func @transform_0(%arg0: i32) -> (i32, i32) {
    %c0_i32 = arith.constant 0 : i32
    %c0_i32_0 = arith.constant 0 : i32
    return %arg0, %c0_i32 : i32, i32
  }
  func.func @transform_1(%arg0: i32) -> (i32, i32) {
    %c0_i32 = arith.constant 0 : i32
    %c0_i32_0 = arith.constant 0 : i32
    %c0_i32_1 = arith.constant 0 : i32
    return %c0_i32, %c0_i32_0 : i32, i32
  }
  func.func @transform_2(%arg0: i32) -> (i32, i32, i32) {
    %c0_i32 = arith.constant 0 : i32
    %c0_i32_0 = arith.constant 0 : i32
    %c0_i32_1 = arith.constant 0 : i32
    %c0_i32_2 = arith.constant 0 : i32
    return %c0_i32, %c0_i32_0, %c0_i32_1 : i32, i32, i32
  }
  func.func @transform_3(%arg0: i32) -> (i32, i32, i32) {
    %c0_i32 = arith.constant 0 : i32
    %c0_i32_0 = arith.constant 0 : i32
    %c0_i32_1 = arith.constant 0 : i32
    %c0_i32_2 = arith.constant 0 : i32
    return %c0_i32, %c0_i32_0, %c0_i32_1 : i32, i32, i32
  }
  func.func @transform_4(%arg0: i32) -> (i32, i32) {
    %c0_i32 = arith.constant 0 : i32
    %c0_i32_0 = arith.constant 0 : i32
    %c0_i32_1 = arith.constant 0 : i32
    return %c0_i32, %c0_i32_0 : i32, i32
  }
  func.func @transform_5(%arg0: i32) -> (i32, i32) {
    %c0_i32 = arith.constant 0 : i32
    %c0_i32_0 = arith.constant 0 : i32
    %c0_i32_1 = arith.constant 0 : i32
    return %c0_i32, %c0_i32_0 : i32, i32
  }
  func.func @transform_6(%arg0: i32) -> (i32, i32) {
    %c0_i32 = arith.constant 0 : i32
    %c0_i32_0 = arith.constant 0 : i32
    return %arg0, %c0_i32 : i32, i32
  }
  func.func @transform_7(%arg0: i32) -> (i32, i32) {
    %c0_i32 = arith.constant 0 : i32
    %c0_i32_0 = arith.constant 0 : i32
    return %arg0, %c0_i32 : i32, i32
  }
}

</mosaic_0001>

<bundles_post_ra>
// kernel: tpu_custom_call.1
= control target key start
LH: loop header
LB: loop body
LE: loop exit
PB: predicated region body
PF: predicated region fallthrough
CT: control target
= control target key end

     0   :  { %13 = vsyncpa [#allocation3], 0  ;;  %s854_s0 = inlined_call_operand.hbm [shape: f32[8,16], index: 0, kind: input, shape index: {}]   ;;  %s855_s1 = inlined_call_operand.hbm [shape: f32[16,32], index: 1, kind: input, shape index: {}]   ;;  %s856_s2 = inlined_call_operand.vmem [shape: f32[3,1,32], index: 2, kind: input, shape index: {}]   ;;  %s857_s3 = inlined_call_operand.hbm [shape: f32[2,32,32], index: 3, kind: input, shape index: {}]   ;;  %s858_s4 = inlined_call_operand.hbm [shape: f32[32,32], index: 4, kind: input, shape index: {}]   ;;  %s859_s5 = inlined_call_operand.vmem [shape: f32[1,32], index: 5, kind: input, shape index: {}]   ;;  %s860_s6 = inlined_call_operand.hbm [shape: f32[8,32], index: 6, kind: output, shape index: {0}]   ;;  %s861_s7 = inlined_call_operand.hbm [shape: s32[8,32], index: 7, kind: output, shape index: {1}]  }
   0x1   :  { %14 = vsyncpa [#allocation6], 0 }
   0x2   :  { %15 = vsyncpa [#allocation9], 0 }
   0x3   :  { %16 = vsyncpa [#allocation4], 0 }
   0x4   :  { %17 = vsyncpa [#allocation12], 0  ;;  %s701_s24 = smov [#allocation5]   ;;  %s559_s28 = scalar_lea.hbm %s855_s1, 256 }
   0x5   :  { %s33_s25 = sshll.u32 %s701_s24, 4  ;;  %p560_p0 = scmp.ne.s32.totalorder %s855_s1, %s559_s28  ;;  %s34_s25 = int_to_ptr.vmem [resolvable:$true] %s33_s25 }
   0x6   :  { %p563_p1 = scmp.lt.u32.totalorder %s559_s28, %s855_s1 }
   0x8   :  { %p565_p2 = pnand %p563_p1, %p560_p0 }
   0xa   :  { %568 = shalt.err (!%p565_p2)
}
   0xb   :  { %s569_s10 = scalar_lea.vmem %s34_s25, 256  ;;  %p574_p4 = scmp.lt.s32.totalorder %s34_s25, %s34_s25 }
   0xc   :  { %p570_p3 = scmp.ne.s32.totalorder %s34_s25, %s569_s10  ;;  %p575_p5 = scmp.lt.s32.totalorder %s569_s10, %s569_s10 }
   0xe   :  { %p576_p6 = por %p575_p5, %p574_p4 }
  0x10   :  { %p577_p7 = pnand %p576_p6, %p570_p3 }
  0x12   :  { %580 = shalt.err (!%p577_p7)
}
  0x13   :  { %s702_s11 = smov 128   ;;  %s703_s12 = smov 8  }
  0x14   :  { %39 = dma.hbm_to_vmem [thread:$0]  %s855_s1, 256, %s34_s25, [#allocation6], %s702_s11, %s702_s11, %s703_s12  }
  0x15   :  { %s704_s15 = smov [#allocation2]   ;;  %s705_s17 = smov [#allocation7]  }
  0x16   :  { %s24_s16 = sshll.u32 %s704_s15, 4  ;;  %s47_s18 = sshll.u32 %s705_s17, 4  ;;  %s25_s16 = int_to_ptr.vmem [resolvable:$true] %s24_s16  ;;  %s48_s18 = int_to_ptr.vmem [resolvable:$true] %s47_s18 }
  0x17   :  { %s581_s21 = scalar_lea.hbm %s854_s0, 128 }
  0x18   :  { %p582_p8 = scmp.ne.s32.totalorder %s854_s0, %s581_s21  ;;  %p585_p9 = scmp.lt.u32.totalorder %s581_s21, %s854_s0 }
  0x1a   :  { %p587_p10 = pnand %p585_p9, %p582_p8 }
  0x1c   :  { %590 = shalt.err (!%p587_p10)
}
  0x1d   :  { %s591_s1 = scalar_lea.vmem %s25_s16, 128  ;;  %p596_p12 = scmp.lt.s32.totalorder %s25_s16, %s25_s16 }
  0x1e   :  { %p592_p11 = scmp.ne.s32.totalorder %s25_s16, %s591_s1  ;;  %p597_p13 = scmp.lt.s32.totalorder %s591_s1, %s591_s1 }
  0x20   :  { %p598_p0 = por %p597_p13, %p596_p12 }
  0x22   :  { %p599_p1 = pnand %p598_p0, %p592_p11 }
  0x24   :  { %602 = shalt.err (!%p599_p1)
}
  0x25   :  { %27 = dma.hbm_to_vmem [thread:$0]  %s854_s0, 128, %s25_s16, [#allocation3]  }
  0x26   :  { %s603_s30 = scalar_lea.hbm %s857_s3, 1024 }
  0x27   :  { %p604_p2 = scmp.ne.s32.totalorder %s857_s3, %s603_s30  ;;  %p607_p3 = scmp.lt.u32.totalorder %s603_s30, %s857_s3 }
  0x29   :  { %p609_p4 = pnand %p607_p3, %p604_p2 }
  0x2b   :  { %612 = shalt.err (!%p609_p4)
}
  0x2c   :  { %s613_s14 = scalar_lea.vmem %s48_s18, 1024  ;;  %p618_p6 = scmp.lt.s32.totalorder %s48_s18, %s48_s18 }
  0x2d   :  { %p614_p5 = scmp.ne.s32.totalorder %s48_s18, %s613_s14  ;;  %p619_p7 = scmp.lt.s32.totalorder %s613_s14, %s613_s14 }
  0x2f   :  { %p620_p8 = por %p619_p7, %p618_p6 }
  0x31   :  { %p621_p9 = pnand %p620_p8, %p614_p5 }
  0x33   :  { %624 = shalt.err (!%p621_p9)
}
  0x34   :  { %53 = dma.hbm_to_vmem [thread:$0]  %s857_s3, 1024, %s48_s18, [#allocation6], %s702_s11, %s702_s11, %s703_s12  }
  0x35   :  { %s706_s16 = smov [#allocation8]   ;;  %s625_s21 = scalar_lea.hbm %s858_s4, 512 }
  0x36   :  { %s59_s17 = sshll.u32 %s706_s16, 4  ;;  %p626_p10 = scmp.ne.s32.totalorder %s858_s4, %s625_s21  ;;  %s60_s17 = int_to_ptr.vmem [resolvable:$true] %s59_s17 }
  0x37   :  { %p629_p11 = scmp.lt.u32.totalorder %s625_s21, %s858_s4 }
  0x39   :  { %p631_p12 = pnand %p629_p11, %p626_p10 }
  0x3b   :  { %634 = shalt.err (!%p631_p12)
}
  0x3c   :  { %s635_s1 = scalar_lea.vmem %s60_s17, 512  ;;  %p640_p0 = scmp.lt.s32.totalorder %s60_s17, %s60_s17 }
  0x3d   :  { %p636_p13 = scmp.ne.s32.totalorder %s60_s17, %s635_s1  ;;  %p641_p1 = scmp.lt.s32.totalorder %s635_s1, %s635_s1 }
  0x3f   :  { %p642_p2 = por %p641_p1, %p640_p0 }
  0x41   :  { %p643_p3 = pnand %p642_p2, %p636_p13 }
  0x43   :  { %646 = shalt.err (!%p643_p3)
}
  0x44   :  { %65 = dma.hbm_to_vmem [thread:$0]  %s858_s4, 512, %s60_s17, [#allocation9], %s702_s11, %s702_s11, %s703_s12  }
  0x45   :  { %691 = dma.done.wait [#allocation3], 128  }
  0x46   :  { %692 = vsyncadd [#allocation3], 4294967168 }
  0x47   :  { %693 = dma.done.wait [#allocation6], 1280  }
  0x48   :  { %694 = vsyncadd [#allocation6], 4294966016 }
  0x49   :  { %695 = dma.done.wait [#allocation9], 512  }
  0x4a   :  { %696 = vsyncadd [#allocation9], 4294966784  ;;  %v707_v0 = vmov 0.0|0.0   ;;  %vm708_vm0 = vmmov 0   ;;  %v709_v1 = vmov 0.0   ;;  %v81_v2 = vld [vmem:[#allocation5] sm:$0xff] }
  0x4b   :  { %525 = vmatprep.subr.bf16.mxu0 %v707_v0  ;;  %489 = vmatprep.mubr.msk.f32.mxu0 %vm708_vm0, %v709_v1  ;;  %v82_v3 = vld [vmem:[#allocation5 + $0x8] sm:$0xff]  ;;  %v165_v5 = vld [vmem:[#allocation7] sm:$0xff]  ;;  %v166_v6 = vld [vmem:[#allocation7 + $0x8] sm:$0xff]  ;;  %vm90_vm1 = vcmask 130048   ;;  %vm177_vm2 = vcmask 261120   ;;  %s710_s8 = smov [#allocation10]  }
  0x4c   :  { %528 = vmatprep.subr.bf16.mxu1 %v707_v0  ;;  %500 = vmatprep.mubr.msk.f32.mxu1 %vm708_vm0, %v709_v1  ;;  %v526_v4 = vpack.c.bf16 %v82_v3, %v81_v2  ;;  %v529_v7 = vpack.c.bf16 %v166_v6, %v165_v5  ;;  %v80_v8 = vld [vmem:[#allocation2] sm:$0xff]  ;;  %v167_v9 = vld [vmem:[#allocation7 + $0x10] sm:$0xff]  ;;  %v168_v10 = vld [vmem:[#allocation7 + $0x18] sm:$0xff]  ;;  %s432_s9 = sshll.u32 %s710_s8, 4  ;;  %s711_s10 = smov [#allocation11]   ;;  %s433_s9 = int_to_ptr.vmem [resolvable:$true] %s432_s9 }
  0x4d   :  { %v532_v11 = vpack.c.bf16 %v168_v10, %v167_v9  ;;  %v253_v12 = vld [vmem:[#allocation7 + $0x20] sm:$0xff]  ;;  %v254_v13 = vld [vmem:[#allocation7 + $0x28] sm:$0xff]  ;;  %v255_v20 = vld [vmem:[#allocation7 + $0x30] sm:$0xff]  ;;  %s442_s13 = sshll.u32 %s711_s10, 4  ;;  %p652_p5 = scmp.lt.s32.totalorder %s433_s9, %s433_s9  ;;  %s443_s13 = int_to_ptr.vmem [resolvable:$true] %s442_s13 }
  0x4e   :  { %527 = vmatpush3.bf16.msra.mxu0 %v526_v4  ;;  %530 = vmatpush3.bf16.msra.mxu1 %v529_v7  ;;  %v535_v14 = vpack.c.bf16 %v254_v13, %v253_v12  ;;  %v457_v15 = vld [vmem:[%s856_s2] ss:$0 sm:$0xff]  ;;  %v256_v21 = vld [vmem:[#allocation7 + $0x38] sm:$0xff]  ;;  %v339_v23 = vld [vmem:[#allocation8] sm:$0xff] }
  0x4f   :  { %534 = vmatprep.subr.bf16.mxu0 %v707_v0  ;;  %531 = vmatprep.subr.bf16.mxu1 %v707_v0  ;;  %v538_v22 = vpack.c.bf16 %v256_v21, %v255_v20  ;;  %v340_v24 = vld [vmem:[#allocation8 + $0x8] sm:$0xff]  ;;  %v341_v31 = vld [vmem:[#allocation8 + $0x10] sm:$0xff]  ;;  %v342_v32 = vld [vmem:[#allocation8 + $0x18] sm:$0xff] }
  0x50   :  { %v541_v25 = vpack.c.bf16 %v340_v24, %v339_v23  ;;  %v460_v26 = vld [vmem:[%s856_s2 + $0x1] ss:$0 sm:$0xff]  ;;  %v544_v33 = vpack.c.bf16 %v342_v32, %v341_v31  ;;  %v463_v34 = vld [vmem:[%s856_s2 + $0x2] ss:$0 sm:$0xff]  ;;  %v465_v39 = vld [vmem:[%s859_s5] ss:$0 sm:$0xff] }
  0x51   :  { %490 = vmatmul.mubr.msk.f32.vlgmr.msra.gmra.mrb[0].mxu0 %vm90_vm1, %v80_v8  ;;  %s647_s2 = scalar_lea.vmem %s433_s9, 128 }
  0x52   :  { %511 = vmatprep.mubr.msk.f32.mxu0 %vm708_vm0, %v709_v1  ;;  %533 = vmatpush3.bf16.msra.mxu1 %v532_v11  ;;  %p648_p4 = scmp.ne.s32.totalorder %s433_s9, %s647_s2  ;;  %p653_p6 = scmp.lt.s32.totalorder %s647_s2, %s647_s2 }
  0x53   :  { %540 = vmatprep.subr.bf16.mxu1 %v707_v0  ;;  %536 = vmatpush3.bf16.msra.mxu0 %v535_v14 }
  0x54   :  { %537 = vmatprep.subr.bf16.mxu0 %v707_v0  ;;  %p654_p7 = por %p653_p6, %p652_p5 }
  0x56   :  { %p655_p8 = pnand %p654_p7, %p648_p4 }
  0x57   :  { %539 = vmatpush3.bf16.msra.mxu0 %v538_v22 }
 0x124   :  { %v160_v16 = vpop.f32.mrb[0].mxu0 }
 0x125   :  { %v161_v17 = vadd.f32 %v457_v15, %v160_v16  ;;  %v491_v18 = vpop.f32.mrb[1].mxu0 }
 0x127   :  { %v164_v19 = vmax.f32 %v161_v17, 0.0 }
 0x129   :  { %501 = vmatmul.mubr.msk.f32.vlgmr.msra.gmra.mrb[0].mxu1 %vm177_vm2, %v164_v19 }
 0x12a   :  { %522 = vmatprep.mubr.msk.f32.mxu1 %vm708_vm0, %v709_v1  ;;  %542 = vmatpush3.bf16.msra.mxu1 %v541_v25 }
 0x12b   :  { %543 = vmatprep.subr.bf16.mxu1 %v707_v0 }
 0x12e   :  { %545 = vmatpush3.bf16.msra.mxu1 %v544_v33 }
 0x1fc   :  { %v247_v27 = vpop.f32.mrb[0].mxu1 }
 0x1fd   :  { %v248_v28 = vadd.f32 %v460_v26, %v247_v27  ;;  %v502_v29 = vpop.f32.mrb[1].mxu1 }
 0x1ff   :  { %v251_v30 = vmax.f32 %v248_v28, 0.0 }
 0x201   :  { %512 = vmatmul.mubr.msk.f32.vlgmr.msra.gmra.mrb[2].mxu0 %vm177_vm2, %v251_v30 }
 0x2d4   :  { %v334_v35 = vpop.f32.mrb[2].mxu0 }
 0x2d5   :  { %v335_v36 = vadd.f32 %v463_v34, %v334_v35  ;;  %v513_v37 = vpop.f32.mrb[3].mxu0 }
 0x2d7   :  { %v338_v38 = vmax.f32 %v335_v36, 0.0 }
 0x2d9   :  { %523 = vmatmul.mubr.msk.f32.vlgmr.msra.gmra.mrb[2].mxu1 %vm177_vm2, %v338_v38 }
 0x3ac   :  { %v419_v40 = vpop.f32.mrb[2].mxu1 }
 0x3ad   :  { %v420_v41 = vadd.f32 %v465_v39, %v419_v40  ;;  %v524_v42 = vpop.f32.mrb[3].mxu1 }
 0x3af   :  { %v546_v43 = vtrunc.f32 %v420_v41  ;;  %423 = vst.msk [vmem:[#allocation10] sm:$0xff] %vm177_vm2, %v420_v41 }
 0x3b0   :  { %658 = shalt.err (!%p655_p8)
}
 0x3b1   :  { %s659_s0 = scalar_lea.hbm %s860_s6, 128 }
 0x3b2   :  { %p660_p9 = scmp.ne.s32.totalorder %s860_s6, %s659_s0  ;;  %p663_p10 = scmp.lt.u32.totalorder %s659_s0, %s860_s6 }
 0x3b4   :  { %p665_p11 = pnand %p663_p10, %p660_p9 }
 0x3b6   :  { %668 = shalt.err (!%p665_p11)
}
 0x3b7   :  { %435 = dma.vmem_to_hbm [thread:$0]  %s433_s9, 128, %s860_s6, [#allocation4]   ;;  %v547_v44 = vcvt.f32.s32 %v546_v43 }
 0x3b8   :  { %s669_s22 = scalar_lea.vmem %s443_s13, 128  ;;  %p674_p13 = scmp.lt.s32.totalorder %s443_s13, %s443_s13 }
 0x3b9   :  { %425 = vst.msk [vmem:[#allocation11] sm:$0xff] %vm177_vm2, %v547_v44  ;;  %p670_p12 = scmp.ne.s32.totalorder %s443_s13, %s669_s22  ;;  %p675_p0 = scmp.lt.s32.totalorder %s669_s22, %s669_s22 }
 0x3bb   :  { %p676_p1 = por %p675_p0, %p674_p13 }
 0x3bd   :  { %p677_p2 = pnand %p676_p1, %p670_p12 }
 0x3bf   :  { %680 = shalt.err (!%p677_p2)
}
 0x3c0   :  { %s681_s26 = scalar_lea.hbm %s861_s7, 128 }
 0x3c1   :  { %p682_p3 = scmp.ne.s32.totalorder %s861_s7, %s681_s26  ;;  %p685_p4 = scmp.lt.u32.totalorder %s681_s26, %s861_s7 }
 0x3c3   :  { %p687_p5 = pnand %p685_p4, %p682_p3 }
 0x3c5   :  { %690 = shalt.err (!%p687_p5)
}
 0x3c6   :  { %445 = dma.vmem_to_hbm [thread:$0]  %s443_s13, 128, %s861_s7, [#allocation12]  }
 0x3c7   :  { %697 = dma.done.wait [#allocation4], 128  }
 0x3c8   :  { %698 = vsyncadd [#allocation4], 4294967168 }
 0x3c9   :  { %699 = dma.done.wait [#allocation12], 128  }
 0x3ca   :  { %700 = vsyncadd [#allocation12], 4294967168 }
 0x3cb   :  { %452 = vsyncpa [#allocation3], 1 }
 0x3cc   :  { %453 = vsyncpa [#allocation6], 1 }
 0x3cd   :  { %454 = vsyncpa [#allocation9], 1 }
 0x3ce   :  { %455 = vsyncpa [#allocation4], 1 }
 0x3cf   :  { %456 = vsyncpa [#allocation12], 1 }

</bundles_post_ra>
